<compile_context>
chip_gen: v7x
topology: tpu7x:2x2x1
jax: 0.10.0
libtpu: 0.0.40
codegen_flags: <defaults>
</compile_context>

<pallas_src>
import jax
import jax.numpy as jnp
from jax.experimental import pallas as pl
from jax.experimental.pallas import tpu as pltpu


# ----------------------------- hyper-parameters ------------------------------
BATCH = 2            # N (example-input batch; forward itself uses x.shape[0])
C_IN = 4             # input_shape[1]
LOOK_BACK = 16       # params['look_back']  (sequence length L)
C_OUT = 8            # conv_1_out_channels
KSIZE = 3            # conv_1_kernel
PAD = 1              # conv_1_padding
POOL = 2             # MaxPool2d_1_kernel_size (MaxPool1d, stride == kernel)
PREDICT_STEPS = 4    # params['predict_steps']

L_CONV = LOOK_BACK + 2 * PAD - KSIZE + 1     # conv output length = 16
L_POOL = L_CONV // POOL                      # pooled length      = 8
TO_LINEAR = C_OUT * L_POOL                   # flatten size       = 64
FC_OUT = PREDICT_STEPS * 2                   # fc1 out features   = 8
XCOLS = C_IN * LOOK_BACK                     # flattened UNPADDED input width = 64
WCOLS = 2 * TO_LINEAR                        # fused even|odd conv width = 128


# ---------------------------------- kernel -----------------------------------
def lenet_fused_kernel(x_ref, w_ref, cb_ref, fw_ref, fb_ref, out_ref):
    """Whole forward pass for the whole batch in one shot.

    x_ref  : (N, XCOLS)        raw input, col = ci*LOOK_BACK + s (no padding)
    w_ref  : (XCOLS, WCOLS)    fused conv weights: [:, :64]  -> even conv pos,
                               [:, 64:] -> odd conv pos; cols in PyTorch
                               flatten order (o*L_POOL + p) within each half.
    cb_ref : (1, WCOLS)        conv bias broadcast over both halves
    fw_ref : (TO_LINEAR, FC_OUT) fc1 weight (transposed)
    fb_ref : (1, FC_OUT)       fc1 bias
    out_ref: (N, FC_OUT)
    """
    x = x_ref[...]                                                    # (N, 64)
    # conv + bias at even AND odd positions in one 128-lane MXU matmul
    s = jnp.dot(x, w_ref[...], preferred_element_type=jnp.float32) + cb_ref[...]
    # MaxPool1d(2) + ReLU: relu(max(even, odd)) -- already in flatten order
    pooled = jnp.maximum(
        jnp.maximum(s[:, :TO_LINEAR], s[:, TO_LINEAR:]), 0.0)        # (N, 64)
    # fc1 + ReLU
    y = jnp.dot(pooled, fw_ref[...], preferred_element_type=jnp.float32) + fb_ref[...]
    out_ref[...] = jnp.maximum(y, 0.0)                                # (N, 8)


# ------------------------- weight packing (done once) ------------------------
def pack_params(conv_w, conv_b, fc_w, fc_b):
    """Input-independent packing of the PyTorch parameters.

    Folds im2col, the zero padding (rows for padded positions are dropped),
    the even/odd split of MaxPool1d(2), and the channel-major torch.flatten
    into ONE conv weight matrix of shape (64, 128).  Run once, outside the
    jitted forward.
    """
    s = jnp.arange(LOOK_BACK)[:, None, None]   # (16, 1, 1) raw input position
    p = jnp.arange(L_POOL)[None, :, None]      # (1,  8, 1) pooled position
    k = jnp.arange(KSIZE)[None, None, :]       # (1,  1, 3) kernel tap
    # conv position l = 2p (even) / 2p+1 (odd); padded index t = l + k;
    # raw index s = t - PAD.  Out-of-range taps hit the zero padding -> dropped.
    delta_e = (s == 2 * p + k - PAD).astype(jnp.float32)
    delta_o = (s == 2 * p + 1 + k - PAD).astype(jnp.float32)

    # W[ci*LOOK_BACK + s, o*L_POOL + p] = conv_w[o, ci, k] where s matches
    w_e = jnp.einsum("ock,spk->csop", conv_w, delta_e).reshape(XCOLS, TO_LINEAR)
    w_o = jnp.einsum("ock,spk->csop", conv_w, delta_o).reshape(XCOLS, TO_LINEAR)
    w_big = jnp.concatenate([w_e, w_o], axis=1)                 # (64, 128)

    cb = jnp.repeat(conv_b, L_POOL)                             # bias per (o, p)
    cb2 = jnp.concatenate([cb, cb]).reshape(1, WCOLS)           # (1, 128)
    fw = fc_w.T                                                 # (64, 8)
    fb = fc_b.reshape(1, FC_OUT)
    return w_big, cb2, fw, fb


# --------------------------------- forward -----------------------------------
@jax.jit
def lenet_forward(x, w_big, cb2, fw, fb):
    """x: (N, C_IN, LOOK_BACK) float32 -> (N, 2, PREDICT_STEPS) float32."""
    n = x.shape[0]
    # only per-call glue: contiguous reshape (ci, s) -> one row (no pad op)
    x_flat = x.reshape(n, XCOLS)

    flops = 2 * n * XCOLS * WCOLS + 2 * n * TO_LINEAR * FC_OUT
    bytes_accessed = 4 * (n * XCOLS + XCOLS * WCOLS + WCOLS
                          + TO_LINEAR * FC_OUT + FC_OUT + n * FC_OUT)

    vmem = pltpu.MemorySpace.VMEM
    fc_out = pl.pallas_call(
        lenet_fused_kernel,
        out_shape=jax.ShapeDtypeStruct((n, FC_OUT), jnp.float32),
        in_specs=[pl.BlockSpec(memory_space=vmem)] * 5,
        out_specs=pl.BlockSpec(memory_space=vmem),
        cost_estimate=pl.CostEstimate(
            flops=flops, transcendentals=0, bytes_accessed=bytes_accessed),
    )(x_flat, w_big, cb2, fw, fb)

    # x.view(-1, 2, predict_steps)
    return fc_out.reshape(-1, 2, PREDICT_STEPS)


# ------------------------------ pure-JAX reference ---------------------------
def lenet_reference(x, conv_w, conv_b, fc_w, fc_b):
    n = x.shape[0]
    y = jax.lax.conv_general_dilated(
        x, conv_w, window_strides=(1,), padding=[(PAD, PAD)],
        dimension_numbers=("NCH", "OIH", "NCH"))
    y = y + conv_b[None, :, None]
    y = jnp.maximum(y, 0.0)
    y = jnp.max(y.reshape(n, C_OUT, L_POOL, POOL), axis=-1)      # MaxPool1d(2)
    flat = y.reshape(n, TO_LINEAR)                               # flatten(x, 1)
    out = jnp.maximum(flat @ fc_w.T + fc_b[None, :], 0.0)
    return out.reshape(-1, 2, PREDICT_STEPS)


# ----------------------------------- main -------------------------------------
if __name__ == "__main__":
    key = jax.random.PRNGKey(0)
    kx, kw1, kb1, kw2, kb2 = jax.random.split(key, 5)

    x = jax.random.normal(kx, (BATCH, C_IN, LOOK_BACK), dtype=jnp.float32)
    conv_w = jax.random.normal(kw1, (C_OUT, C_IN, KSIZE), dtype=jnp.float32) * 0.1
    conv_b = jax.random.normal(kb1, (C_OUT,), dtype=jnp.float32) * 0.1
    fc_w = jax.random.normal(kw2, (FC_OUT, TO_LINEAR), dtype=jnp.float32) * 0.1
    fc_b = jax.random.normal(kb2, (FC_OUT,), dtype=jnp.float32) * 0.1

    # pack weights once (input-independent; not part of the per-call path)
    w_big, cb2, fw, fb = pack_params(conv_w, conv_b, fc_w, fc_b)

    out = lenet_forward(x, w_big, cb2, fw, fb)
    out = jax.block_until_ready(out)

    ref = lenet_reference(x, conv_w, conv_b, fc_w, fc_b)
    assert out.shape == (BATCH, 2, PREDICT_STEPS), out.shape
    assert jnp.allclose(out, ref, atol=1e-5, rtol=1e-5), "mismatch vs reference"

    print("KERNEL_OK")
</pallas_src>

<mosaic_0001>
module attributes {stable_mosaic.version = 11 : i64} {
  func.func @lenet_fused_kernel(%arg0: memref<2x64xf32, #tpu.memory_space<vmem>>, %arg1: memref<64x128xf32, #tpu.memory_space<vmem>>, %arg2: memref<1x128xf32, #tpu.memory_space<vmem>>, %arg3: memref<64x8xf32, #tpu.memory_space<vmem>>, %arg4: memref<1x8xf32, #tpu.memory_space<vmem>>, %arg5: memref<2x8xf32, #tpu.memory_space<vmem>>) attributes {dimension_semantics = [], scalar_prefetch = 0 : i64, scratch_operands = 0 : i64, tpu.core_type = #tpu.core_type<tc>} {
    %c0 = arith.constant 0 : index
    %c0_0 = arith.constant 0 : index
    %0 = vector.load %arg0[%c0, %c0_0] : memref<2x64xf32, #tpu.memory_space<vmem>>, vector<2x64xf32>
    %c0_1 = arith.constant 0 : index
    %c0_2 = arith.constant 0 : index
    %1 = vector.load %arg1[%c0_1, %c0_2] : memref<64x128xf32, #tpu.memory_space<vmem>>, vector<64x128xf32>
    %cst = arith.constant dense<0.000000e+00> : vector<2x128xf32>
    %2 = tpu.matmul %0, %1, %cst {dimension_numbers = #tpu.dot_dimension_numbers<[1], [0], [0], [1], [0, 0, 1, 1], [], []>} : vector<2x64xf32>, vector<64x128xf32>, vector<2x128xf32> -> vector<2x128xf32>
    %c0_3 = arith.constant 0 : index
    %c0_4 = arith.constant 0 : index
    %3 = vector.load %arg2[%c0_3, %c0_4] : memref<1x128xf32, #tpu.memory_space<vmem>>, vector<1x128xf32>
    %4 = vector.broadcast %3 : vector<1x128xf32> to vector<2x128xf32>
    %5 = arith.addf %2, %4 : vector<2x128xf32>
    %6 = vector.extract_strided_slice %5 {offsets = [0, 0], sizes = [2, 64], strides = [1, 1]} : vector<2x128xf32> to vector<2x64xf32>
    %7 = vector.extract_strided_slice %5 {offsets = [0, 64], sizes = [2, 64], strides = [1, 1]} : vector<2x128xf32> to vector<2x64xf32>
    %8 = arith.maximumf %6, %7 : vector<2x64xf32>
    %cst_5 = arith.constant 0.000000e+00 : f32
    %9 = vector.broadcast %cst_5 : f32 to vector<2x64xf32>
    %10 = arith.maximumf %8, %9 : vector<2x64xf32>
    %c0_6 = arith.constant 0 : index
    %c0_7 = arith.constant 0 : index
    %11 = vector.load %arg3[%c0_6, %c0_7] : memref<64x8xf32, #tpu.memory_space<vmem>>, vector<64x8xf32>
    %cst_8 = arith.constant dense<0.000000e+00> : vector<2x8xf32>
    %12 = tpu.matmul %10, %11, %cst_8 {dimension_numbers = #tpu.dot_dimension_numbers<[1], [0], [0], [1], [0, 0, 1, 1], [], []>} : vector<2x64xf32>, vector<64x8xf32>, vector<2x8xf32> -> vector<2x8xf32>
    %c0_9 = arith.constant 0 : index
    %c0_10 = arith.constant 0 : index
    %13 = vector.load %arg4[%c0_9, %c0_10] : memref<1x8xf32, #tpu.memory_space<vmem>>, vector<1x8xf32>
    %14 = vector.broadcast %13 : vector<1x8xf32> to vector<2x8xf32>
    %15 = arith.addf %12, %14 : vector<2x8xf32>
    %cst_11 = arith.constant 0.000000e+00 : f32
    %16 = vector.broadcast %cst_11 : f32 to vector<2x8xf32>
    %17 = arith.maximumf %15, %16 : vector<2x8xf32>
    %c0_12 = arith.constant 0 : index
    %c0_13 = arith.constant 0 : index
    %18 = vector.load %arg5[%c0_12, %c0_13] : memref<2x8xf32, #tpu.memory_space<vmem>>, vector<2x8xf32>
    tpu.vector_store %arg5[%c0_12, %c0_13], %17 {strides = array<i32>} : memref<2x8xf32, #tpu.memory_space<vmem>>, vector<2x8xf32>,
    return
  }
}

</mosaic_0001>

<bundles_post_ra>
// kernel: lenet_forward.1
= control target key start
LH: loop header
LB: loop body
LE: loop exit
PB: predicated region body
PF: predicated region fallthrough
CT: control target
= control target key end

     0   :  { %v299_v0 = vmov 0.0|0.0   ;;  %vm300_vm0 = vmmov 0   ;;  %v301_v4 = vmov 0.0   ;;  %vm36_vm1 = vcmask 523264   ;;  %s302_s27 = smov 64   ;;  %s395_s1 = inlined_call_operand.vmem [shape: f32[64,128], index: 1, kind: input, shape index: {}]   ;;  %s396_s0 = inlined_call_operand.vmem [shape: f32[2,64], index: 0, kind: input, shape index: {}]   ;;  %s397_s3 = inlined_call_operand.vmem [shape: f32[64,8], index: 3, kind: input, shape index: {}]   ;;  %s398_s2 = inlined_call_operand.vmem [shape: f32[1,128], index: 2, kind: input, shape index: {}]   ;;  %s399_s4 = inlined_call_operand.vmem [shape: f32[1,8], index: 4, kind: input, shape index: {}]   ;;  %s400_s5 = inlined_call_operand.vmem [shape: f32[2,8], index: 5, kind: output, shape index: {}]  }
   0x1   :  { %271 = vmatprep.subr.bf16.mxu0 %v299_v0  ;;  %v21_v1 = vld [vmem:[%s395_s1] sm:$0xff]  ;;  %v22_v2 = vld [vmem:[%s395_s1 + $0x8] sm:$0xff]  ;;  %v23_v3 = vld [vmem:[%s395_s1 + $0x10] sm:$0xff]  ;;  %249 = vmatprep.mubr.msk.f32.mxu0 %vm300_vm0, %v301_v4  ;;  %vm205_vm2 = vcmask 58368  }
   0x2   :  { %v272_v5 = vpack.c.bf16 %v22_v2, %v21_v1  ;;  %v24_v6 = vld [vmem:[%s395_s1 + $0x18] sm:$0xff]  ;;  %283 = vmatprep.subr.bf16.mxu1 %v299_v0  ;;  %268 = vmatprep.mubr.msk.f32.mxu1 %vm300_vm0, %v301_v4  ;;  %v25_v8 = vld [vmem:[%s395_s1 + $0x20] sm:$0xff]  ;;  %v26_v9 = vld [vmem:[%s395_s1 + $0x28] sm:$0xff] }
   0x3   :  { %v275_v7 = vpack.c.bf16 %v24_v6, %v23_v3  ;;  %v278_v10 = vpack.c.bf16 %v26_v9, %v25_v8  ;;  %v27_v11 = vld [vmem:[%s395_s1 + $0x30] sm:$0xff]  ;;  %v28_v12 = vld [vmem:[%s395_s1 + $0x38] sm:$0xff]  ;;  %v20_v14 = vld [vmem:[%s396_s0] sm:$0x3] }
   0x4   :  { %273 = vmatpush3.bf16.msra.mxu0 %v272_v5  ;;  %v281_v13 = vpack.c.bf16 %v28_v12, %v27_v11  ;;  %v116_v15 = vld [vmem:[%s397_s3] sm:$0xff]  ;;  %v117_v16 = vld [vmem:[%s397_s3 + $0x8] sm:$0xff]  ;;  %v118_v17 = vld [vmem:[%s397_s3 + $0x10] sm:$0xff] }
   0x5   :  { %274 = vmatprep.subr.bf16.mxu0 %v299_v0  ;;  %v284_v18 = vpack.c.bf16 %v117_v16, %v116_v15  ;;  %v119_v19 = vld [vmem:[%s397_s3 + $0x18] sm:$0xff]  ;;  %v120_v21 = vld [vmem:[%s397_s3 + $0x20] sm:$0xff]  ;;  %v121_v22 = vld [vmem:[%s397_s3 + $0x28] sm:$0xff] }
   0x6   :  { %v287_v20 = vpack.c.bf16 %v119_v19, %v118_v17  ;;  %v290_v23 = vpack.c.bf16 %v121_v22, %v120_v21  ;;  %v122_v24 = vld [vmem:[%s397_s3 + $0x30] sm:$0xff]  ;;  %v123_v25 = vld [vmem:[%s397_s3 + $0x38] sm:$0xff]  ;;  %v211_v27 = vld [vmem:[%s398_s2] ss:$0 sm:$0xff] }
   0x7   :  { %285 = vmatpush3.bf16.msra.mxu1 %v284_v18  ;;  %v293_v26 = vpack.c.bf16 %v123_v25, %v122_v24  ;;  %v213_v34 = vld [vmem:[%s399_s4] ss:$0 sm:$0xff] }
   0x8   :  { %276 = vmatpush3.bf16.msra.mxu0 %v275_v7  ;;  %286 = vmatprep.subr.bf16.mxu1 %v299_v0 }
   0x9   :  { %277 = vmatprep.subr.bf16.mxu0 %v299_v0 }
   0xb   :  { %288 = vmatpush3.bf16.msra.mxu1 %v287_v20 }
   0xc   :  { %279 = vmatpush3.bf16.msra.mxu0 %v278_v10  ;;  %289 = vmatprep.subr.bf16.mxu1 %v299_v0 }
   0xd   :  { %280 = vmatprep.subr.bf16.mxu0 %v299_v0 }
   0xf   :  { %291 = vmatpush3.bf16.msra.mxu1 %v290_v23 }
  0x10   :  { %282 = vmatpush3.bf16.msra.mxu0 %v281_v13  ;;  %292 = vmatprep.subr.bf16.mxu1 %v299_v0 }
  0x13   :  { %250 = vmatmul.mubr.msk.f32.vlgmr.msra.gmra.mrb[0].mxu0 %vm36_vm1, %v20_v14  ;;  %294 = vmatpush3.bf16.msra.mxu1 %v293_v26 }
  0xe6   :  { %v106_v28 = vpop.f32.mrb[0].mxu0 }
  0xe7   :  { %v107_v29 = vadd.f32 %v211_v27, %v106_v28  ;;  %v251_v30 = vpop.f32.mrb[1].mxu0 }
  0xe9   :  { %111 = vrot.lane.b32.xlu0 %v107_v29, %s302_s27 }
 0x15b   :  { %v112_v31 = vpop.permute.xlu0 %111 }
 0x15c   :  { %v114_v32 = vmax.f32 %v107_v29, %v112_v31 }
 0x15e   :  { %v115_v33 = vmax.f32 %v114_v32, 0.0 }
 0x160   :  { %269 = vmatmul.mubr.msk.f32.vlgmr.msra.gmra.mrb[0].mxu1 %vm36_vm1, %v115_v33 }
 0x233   :  { %v200_v35 = vpop.f32.mrb[0].mxu1 }
 0x234   :  { %v201_v36 = vadd.f32 %v213_v34, %v200_v35  ;;  %v270_v37 = vpop.f32.mrb[1].mxu1 }
 0x236   :  { %v204_v38 = vmax.f32 %v201_v36, 0.0 }
 0x238   :  { %206 = vst.msk [vmem:[%s400_s5] sm:$0x3] %vm205_vm2, %v204_v38 }

</bundles_post_ra>
